<compile_context>
chip_gen: v6e
topology: v6e:2x2x1
jax: 0.10.0
libtpu: 0.0.40
codegen_flags: <defaults>
</compile_context>

<pallas_src>
import functools

import jax
import jax.numpy as jnp
from jax import lax
from jax.experimental import pallas as pl
from jax.experimental.pallas import tpu as pltpu


def _mix32(v):
    """lowbias32 finalizer: uint32 -> well-mixed uint32 (pure integer ops)."""
    v = v ^ (v >> 16)
    v = v * jnp.uint32(0x7FEB352D)
    v = v ^ (v >> 15)
    v = v * jnp.uint32(0x846CA68B)
    v = v ^ (v >> 16)
    return v


def _pos_enc_kernel(seed_ref, x_ref, p_ref, o_ref, *, dropout_p, use_hw_prng):
    # x_ref: (1, TR, C) block of x; p_ref: (1, TR, C) block of P (shared over batch).
    y = x_ref[...] + p_ref[...]

    if dropout_p > 0.0:
        shape = y.shape
        thr24 = int(dropout_p * (1 << 24))  # drop prob = thr24 / 2^24

        if use_hw_prng:
            # Hardware PRNG: per-tile independent stream, ~1 op per vreg.
            pltpu.prng_seed(seed_ref[0], pl.program_id(0), pl.program_id(1))
            bits = pltpu.prng_random_bits(shape)
            low = bits & jnp.array(0x00FFFFFF, dtype=bits.dtype)   # sign-safe
            keep = low >= jnp.array(thr24, dtype=bits.dtype)
        else:
            # Fallback (non-TPU backend / interpret mode): stateless counter hash.
            # Scalar salt is pre-mixed once per tile so only one per-element
            # combine (xor) + finalizer remain on the vector units.
            r = pl.program_id(0)
            b = pl.program_id(1)
            tile_id = (r * pl.num_programs(1) + b).astype(jnp.uint32)
            seed_u = seed_ref[0].astype(jnp.uint32)
            salt = _mix32(seed_u * jnp.uint32(0x9E3779B1) ^ tile_id)
            rows = lax.broadcasted_iota(jnp.int32, shape, 1).astype(jnp.uint32)
            cols = lax.broadcasted_iota(jnp.int32, shape, 2).astype(jnp.uint32)
            elem = rows * jnp.uint32(shape[2]) + cols
            bits = _mix32(elem ^ salt)
            keep = (bits & jnp.uint32(0x00FFFFFF)) >= jnp.uint32(thr24)

        scale = jnp.asarray(1.0 / (1.0 - dropout_p), dtype=y.dtype)
        y = y * jnp.where(keep, scale, jnp.zeros_like(scale))

    o_ref[...] = y.astype(o_ref.dtype)


def make_positional_table(num_hiddens, max_len=1000, dtype=jnp.float32):
    """Deterministic parameter setup mirroring the torch __init__."""
    pos = jnp.arange(max_len, dtype=jnp.float32).reshape(-1, 1)
    div = jnp.power(
        10000.0, jnp.arange(0, num_hiddens, 2, dtype=jnp.float32) / num_hiddens
    )
    X = pos / div  # (max_len, ceil(H/2))
    P = jnp.zeros((1, max_len, num_hiddens), dtype=jnp.float32)
    P = P.at[:, :, 0::2].set(jnp.sin(X)[None])
    P = P.at[:, :, 1::2].set(jnp.cos(X)[None, :, : num_hiddens // 2])
    return P.astype(dtype)


def _block_budget_bytes():
    """(per-block byte target, scoped-VMEM limit) chosen per TPU generation."""
    try:
        info = pltpu.get_tpu_info()
        vmem = getattr(info, "vmem_capacity_bytes", 0) or 0
        if vmem >= 96 * 1024 * 1024:
            # v5e / v6e: 128 MiB physical VMEM -> larger blocks amortize
            # per-step pipeline overhead.  3 arrays x 2 buffers x 4 MiB = 24 MiB.
            return 4 * 1024 * 1024, 64 * 1024 * 1024
    except Exception:
        pass
    # v7x (64 MiB VMEM per TC) or unknown: stay at ~2 MiB blocks.
    return 2 * 1024 * 1024, 32 * 1024 * 1024


def positional_encoding(x, P, *, dropout_p=0.0, seed=0, training=True):
    """x: (B, S, H).  Returns dropout(x + P[:, :S, :])."""
    B, S, H = x.shape
    p_slice = P[:, :S, :].astype(x.dtype)
    p = float(dropout_p) if training else 0.0

    # Lane-dense view: fold (S, H) into rows of 128 lanes whenever possible so
    # output stores are unmasked full-width vst even when H < 128.
    if (S * H) % 128 == 0:
        C = 128
        R = (S * H) // C
    else:
        C = H
        R = S
    x3 = x.reshape(B, R, C)
    p3 = p_slice.reshape(1, R, C)

    itemsize = jnp.dtype(x.dtype).itemsize
    block_bytes, vmem_limit = _block_budget_bytes()
    sublane = 8 * max(1, 4 // itemsize)  # 8 (f32), 16 (bf16), 32 (int8/fp8)
    target_rows = max(sublane, block_bytes // (C * itemsize))
    if R <= target_rows:
        TR = R                                        # full extent: always legal
    else:
        TR = max(sublane, (target_rows // sublane) * sublane)
    n_r = pl.cdiv(R, TR)

    # HW PRNG on real TPUs; integer-hash fallback elsewhere (interpret/CPU).
    use_hw_prng = (p > 0.0) and (jax.default_backend() == "tpu")
    seed_arr = jnp.asarray([seed], dtype=jnp.int32)
    kernel = functools.partial(_pos_enc_kernel, dropout_p=p, use_hw_prng=use_hw_prng)

    out3 = pl.pallas_call(
        kernel,
        out_shape=jax.ShapeDtypeStruct((B, R, C), x.dtype),
        grid=(n_r, B),  # batch innermost: P tile stays resident across batch steps
        in_specs=[
            pl.BlockSpec(memory_space=pltpu.MemorySpace.SMEM),   # seed scalar
            pl.BlockSpec((1, TR, C), lambda r, b: (b, r, 0)),    # x
            pl.BlockSpec((1, TR, C), lambda r, b: (0, r, 0)),    # P (batch-invariant)
        ],
        out_specs=pl.BlockSpec((1, TR, C), lambda r, b: (b, r, 0)),
        compiler_params=pltpu.CompilerParams(
            # Shard only the row axis across v7x's 2 TCs; batch stays resident.
            dimension_semantics=("parallel", "arbitrary"),
            vmem_limit_bytes=vmem_limit,
        ),
    )(seed_arr, x3, p3)

    return out3.reshape(B, S, H)


if __name__ == "__main__":
    B, S, H = 2, 8, 32
    max_len = 1000
    dropout_p = 0.1

    key = jax.random.PRNGKey(0)
    x = jax.random.normal(key, (B, S, H), dtype=jnp.float32)
    P = make_positional_table(H, max_len=max_len)
    ref = x + P[:, :S, :]

    # Eval mode (dropout off): must exactly equal x + P[:, :S, :].
    out_eval = positional_encoding(x, P, dropout_p=dropout_p, training=False)
    jax.block_until_ready(out_eval)
    assert out_eval.shape == (B, S, H)
    assert jnp.allclose(out_eval, ref, atol=1e-6), "eval-mode mismatch"

    # Training mode: every element is either 0 or (x+P)/(1-p).
    out_train = positional_encoding(x, P, dropout_p=dropout_p, seed=1234, training=True)
    jax.block_until_ready(out_train)
    assert out_train.shape == (B, S, H)
    scaled = ref / (1.0 - dropout_p)
    ok = jnp.isclose(out_train, 0.0, atol=1e-6) | jnp.isclose(out_train, scaled, atol=1e-5)
    assert bool(jnp.all(ok)), "training-mode dropout values off"

    # Second, lane-aligned shape exercising the gridded path (H multiple of 128).
    B2, S2, H2 = 2, 64, 128
    x2 = jax.random.normal(jax.random.PRNGKey(1), (B2, S2, H2), dtype=jnp.float32)
    P2 = make_positional_table(H2, max_len=max_len)
    out2 = positional_encoding(x2, P2, dropout_p=0.0, training=True)
    jax.block_until_ready(out2)
    assert jnp.allclose(out2, x2 + P2[:, :S2, :], atol=1e-6), "lane-dense path mismatch"

    # Training mode on the lane-aligned shape (exercises HW-PRNG path at scale).
    out2_train = positional_encoding(x2, P2, dropout_p=0.25, seed=7, training=True)
    jax.block_until_ready(out2_train)
    ref2 = x2 + P2[:, :S2, :]
    scaled2 = ref2 / 0.75
    ok2 = jnp.isclose(out2_train, 0.0, atol=1e-6) | jnp.isclose(out2_train, scaled2, atol=1e-5)
    assert bool(jnp.all(ok2)), "training-mode (lane-dense) dropout values off"

    print("KERNEL_OK")
</pallas_src>

<mosaic_0001>
module attributes {stable_mosaic.version = 11 : i64} {
  func.func @_pos_enc_kernel(%arg0: i32, %arg1: i32, %arg2: memref<1xi32, #tpu.memory_space<smem>>, %arg3: memref<1x2x128xf32, #tpu.memory_space<vmem>>, %arg4: memref<1x2x128xf32, #tpu.memory_space<vmem>>, %arg5: memref<1x2x128xf32, #tpu.memory_space<vmem>>) attributes {dimension_semantics = [#tpu.dimension_semantics<parallel>, #tpu.dimension_semantics<arbitrary>], iteration_bounds = array<i64: 1, 2>, scalar_prefetch = 0 : i64, scratch_operands = 0 : i64, tpu.core_type = #tpu.core_type<tc>, window_params = [{transform_indices = @transform_0, window_bounds = array<i64: 1>}, {transform_indices = @transform_1, window_bounds = array<i64: 1, 2, 128>}, {transform_indices = @transform_2, window_bounds = array<i64: 1, 2, 128>}, {transform_indices = @transform_3, window_bounds = array<i64: 1, 2, 128>}]} {
    %c0 = arith.constant 0 : index
    %c0_0 = arith.constant 0 : index
    %c0_1 = arith.constant 0 : index
    %0 = vector.load %arg3[%c0, %c0_0, %c0_1] : memref<1x2x128xf32, #tpu.memory_space<vmem>>, vector<1x2x128xf32>
    %c0_2 = arith.constant 0 : index
    %c0_3 = arith.constant 0 : index
    %c0_4 = arith.constant 0 : index
    %1 = vector.load %arg4[%c0_2, %c0_3, %c0_4] : memref<1x2x128xf32, #tpu.memory_space<vmem>>, vector<1x2x128xf32>
    %2 = arith.addf %0, %1 : vector<1x2x128xf32>
    %c0_5 = arith.constant 0 : index
    %c0_6 = arith.constant 0 : index
    %c0_7 = arith.constant 0 : index
    %3 = vector.load %arg5[%c0_5, %c0_6, %c0_7] : memref<1x2x128xf32, #tpu.memory_space<vmem>>, vector<1x2x128xf32>
    tpu.vector_store %arg5[%c0_5, %c0_6, %c0_7], %2 {strides = array<i32>} : memref<1x2x128xf32, #tpu.memory_space<vmem>>, vector<1x2x128xf32>,
    return
  }
  func.func @transform_0(%arg0: i32, %arg1: i32) -> i32 {
    %c0_i32 = arith.constant 0 : i32
    %c0_i32_0 = arith.constant 0 : i32
    return %c0_i32 : i32
  }
  func.func @transform_1(%arg0: i32, %arg1: i32) -> (i32, i32, i32) {
    %c0_i32 = arith.constant 0 : i32
    %c0_i32_0 = arith.constant 0 : i32
    return %arg1, %arg0, %c0_i32 : i32, i32, i32
  }
  func.func @transform_2(%arg0: i32, %arg1: i32) -> (i32, i32, i32) {
    %c0_i32 = arith.constant 0 : i32
    %c0_i32_0 = arith.constant 0 : i32
    %c0_i32_1 = arith.constant 0 : i32
    return %c0_i32, %arg0, %c0_i32_0 : i32, i32, i32
  }
  func.func @transform_3(%arg0: i32, %arg1: i32) -> (i32, i32, i32) {
    %c0_i32 = arith.constant 0 : i32
    %c0_i32_0 = arith.constant 0 : i32
    return %arg1, %arg0, %c0_i32 : i32, i32, i32
  }
}

</mosaic_0001>

<bundles_post_ra>
// kernel: tpu_custom_call.1
= control target key start
LH: loop header
LB: loop body
LE: loop exit
PB: predicated region body
PF: predicated region fallthrough
CT: control target
= control target key end

     0   :  { %9 = vsyncpa [#allocation4], 0  ;;  %s680_s0 = inlined_call_operand.<no memory space> [shape: s32[1], index: 0, kind: input, shape index: {}]   ;;  %s681_s1 = inlined_call_operand.hbm [shape: f32[2,2,128], index: 1, kind: input, shape index: {}]   ;;  %s682_s2 = inlined_call_operand.vmem [shape: f32[1,2,128], index: 2, kind: input, shape index: {}]   ;;  %s683_s3 = inlined_call_operand.hbm [shape: f32[2,2,128], index: 3, kind: output, shape index: {}]  }
   0x1   :  { %11 = vsyncpa [#allocation4 + $0x1], 0 }
   0x2   :  { %12 = vsyncpa [#allocation5], 0 }
   0x3   :  { %14 = vsyncpa [#allocation5 + $0x1], 0  ;;  %s543_s12 = smov 0   ;;  %s545_s13 = smov 0  }
   0x4   :  { %s547_s14 = smov 0   ;;  %s549_s0 = smov 0  }
   0x5   :  { %s551_s15 = smov 0   ;;  %s553_s16 = smov 0  }
   0x6 LB: > { %s335_s17 = sadd.s32 4294967295, %s519_s16   ;;  %s336_s18 = sadd.s32 4294967294, %s519_s16   ;;  %s519_s16 = sphi %s553_s16, %s20_s16   ;;  %s515_s15 = sphi %s551_s15, %s695_s15   ;;  %s511_s0 = sphi %s549_s0, %s694_s0   ;;  %s507_s14 = sphi %s547_s14, %s693_s14   ;;  %s503_s13 = sphi %s545_s13, %s692_s13   ;;  %s499_s12 = sphi %s543_s12, %s691_s12  }
   0x7   : > { %s29_s19 = sadd.s32 1, %s515_s15  ;;  %s62_s20 = sadd.s32 1, %s507_s14 }
   0x8   : > { %p30_p0 = scmp.ge.s32.totalorder %s29_s19, 2  ;;  %p69_p1 = scmp.ne.s32.totalorder %s507_s14, %s503_s13 }
   0x9   : > { %p70_p2 = scmp.eq.s32.totalorder %s519_s16, 0  ;;  %p75_p3 = scmp.ne.s32.totalorder %s503_s13, %s499_s12 }
   0xa   : > { %s697_s19 = smov (%p30_p0, %s29_s19), 0  ;;  %p76_p5 = scmp.eq.s32.totalorder %s335_s17, 0 }
   0xb   : > { %p584_p4 = por %p70_p2, %p69_p1  ;;  %s57_s22 = ssub.s32 %s515_s15, %s697_s19 }
   0xc   : > { %p127_p6 = scmp.eq.s32.totalorder %s335_s17, 1  ;;  %p60_p7 = scmp.eq.s32.totalorder %s57_s22, 0 }
   0xd   : > { %p590_p8 = por %p76_p5, %p75_p3  ;;  %p133_p10 = scmp.eq.s32.totalorder %s336_s18, 1 }
   0xe   : > { %p594_p9 = por %p127_p6, %p69_p1  ;;  %p361_p13 = scmp.lt.s32.totalorder %s519_s16, 2 }
   0xf   : > { %s599_s25 = scalar_select %p60_p7, %s507_s14, %s62_s20  }
  0x10   : > { %p601_p11 = por %p133_p10, %p75_p3  ;;  %s163_s27 = sand.u32 1, %s507_s14  }
  0x11   : > { %s340_s28 = sshll.u32 %s163_s27, 1  ;;  %s341_s29 = sshll.u32 %s515_s15, 5 }
  0x12   : > { %s687_s26 = scalar_select %p601_p11, 1, 0 }
  0x13   : > { %s173_s5 = scalar_lea.hbm %s681_s1, %s341_s29  ;;  %s167_s6 = scalar_lea.vmem [#allocation3], %s340_s28 }
  0x14   : > { %s175_s7 = sshll.u32 %s167_s6, 4  ;;  %p614_p0 = pnand %p361_p13, %p584_p4  ;;  %s176_s7 = int_to_ptr.vmem [resolvable:$true] %s175_s7 }
  0x15   : > { %p342_p1 = scmp.ge.s32.totalorder %s519_s16, 1  ;;  %p180_p2 = scmp.lt.s32.totalorder %s519_s16, 3 }
  0x16   : > { %s164_s9 = scalar_lea.sflag [#allocation4], %s163_s27  ;;  %p413_p3 = pneg %p614_p0 }
  0x17   : > { %s424_s10 = scalar_lea.vmem %s176_s7, 32  ;;  %s521_s11 = smov [#allocation3]  }
  0x18   : > { %p425_p5 = scmp.ne.s32.totalorder %s176_s7, %s424_s10  ;;  %s429_s17 = sshll.u32 %s521_s11, 4  ;;  %s430_s17 = int_to_ptr.vmem [resolvable:$false] %s429_s17 }
  0x19   : > { %s431_s18 = scalar_lea.vmem %s430_s17, 64  ;;  %p432_p10 = scmp.lt.s32.totalorder %s176_s7, %s430_s17 }
  0x1a   : > { %p427_p6 = pnand %p425_p5, %p413_p3  ;;  %p433_p12 = scmp.lt.s32.totalorder %s431_s18, %s424_s10 }
  0x1c   : > { %p428_p7 = pneg %p427_p6  ;;  %p434_p4 = por %p433_p12, %p432_p10 }
  0x1e   : > { %p435_p13 = pnand %p434_p4, %p428_p7 }
  0x20   : > { %438 = shalt.err (!%p435_p13)
}
  0x21   : > { %356 = dma.hbm_to_vmem [thread:$0]  (!%p614_p0), %s173_s5, 32, %s176_s7, %s164_s9  }
  0x22   : > { %p181_p11 = pnand %p342_p1, %p180_p2 }
  0x23   : > { %s629_s20 = sand.u32 (!%p181_p11), 1, %s503_s13  }
  0x24   : > { %184 = sbr.rel (%p181_p11) target bundleno = 66 (0x42), region = 32  ;;  %s343_s21 = sshll.u32 (!%p181_p11), %s629_s20, 1 }
  0x25   : > { %s187_s22 = scalar_lea.sflag (!%p181_p11), [#allocation4], %s629_s20  ;;  %s190_s27 = scalar_lea.vmem (!%p181_p11), [#allocation3], %s343_s21 }
  0x29   : > { %490 = dma.done.wait (%p590_p8), %s187_s22, 32  }
  0x2a   : > { %492 = vsyncadd (%p590_p8), %s187_s22, 4294967264  ;;  %s216_s28 = scalar_lea.vmem [#allocation6], %s343_s21  ;;  %s346_s30 = sshll.u32 %s511_s0, 5  ;;  %v221_v0 = vld [vmem:[%s190_s27] sm:$0x3] }
  0x2b   : > { %s240_s29 = sshll.u32 %s216_s28, 4  ;;  %v222_v1 = vld [vmem:[%s682_s2] sm:$0x3]  ;;  %s238_s8 = scalar_lea.hbm %s683_s3, %s346_s30  ;;  %s241_s29 = int_to_ptr.vmem [resolvable:$true] %s240_s29 }
  0x2c   : > { %v223_v2 = vadd.f32 %v222_v1, %v221_v0  ;;  %s226_s23 = scalar_lea.sflag [#allocation5], %s629_s20  ;;  %s439_s9 = scalar_lea.vmem %s241_s29, 32 }
  0x2d   : > { %p440_p8 = scmp.ne.s32.totalorder %s241_s29, %s439_s9  ;;  %s522_s10 = smov [#allocation6]  }
  0x2e   : > { %224 = vst [vmem:[%s216_s28] sm:$0x3] %v223_v2  ;;  %s443_s0 = sshll.u32 %s522_s10, 4  ;;  %s444_s0 = int_to_ptr.vmem [resolvable:$false] %s443_s0 }
  0x2f   : > { %p441_p11 = pnand %p440_p8, %p594_p9  ;;  %s445_s11 = scalar_lea.vmem %s444_s0, 64 }
  0x30   : > { %p446_p0 = scmp.lt.s32.totalorder %s241_s29, %s444_s0  ;;  %p447_p1 = scmp.lt.s32.totalorder %s445_s11, %s439_s9 }
  0x31   : > { %p442_p12 = pneg %p441_p11 }
  0x32   : > { %p448_p2 = por %p447_p1, %p446_p0 }
  0x34   : > { %p449_p3 = pnand %p448_p2, %p442_p12 }
  0x36   : > { %452 = shalt.err (!%p449_p3)
}
  0x37   : > { %s453_s17 = scalar_lea.hbm %s238_s8, 32  ;;  %s457_s21 = scalar_lea.hbm %s683_s3, 64 }
  0x38   : > { %p454_p5 = scmp.ne.s32.totalorder %s238_s8, %s453_s17  ;;  %p458_p10 = scmp.lt.s32.totalorder %s238_s8, %s683_s3 }
  0x39   : > { %p459_p4 = scmp.lt.s32.totalorder %s457_s21, %s453_s17 }
  0x3a   : > { %p455_p6 = pnand %p454_p5, %p594_p9 }
  0x3b   : > { %p460_p13 = por %p459_p4, %p458_p10 }
  0x3c   : > { %p456_p7 = pneg %p455_p6 }
  0x3e   : > { %p461_p8 = pnand %p460_p13, %p456_p7 }
  0x40   : > { %464 = shalt.err (!%p461_p8)
}
  0x41   : > { %351 = dma.vmem_to_hbm [thread:$0]  (%p594_p9), %s241_s29, 32, %s238_s8, %s226_s23  }
  0x42 PF: > { %s252_s28 = sand.u32 1, %s499_s12   ;;  %p689_p11 = scmp.ne.s32.totalorder %s687_s26, 0 }
  0x43   : > { %p690_p12 = scmp.ge.s32.totalorder %s519_s16, 2  ;;  %s253_s30 = scalar_lea.sflag [#allocation5], %s252_s28 }
  0x45   : > { %p358_p0 = pnand %p690_p12, %p689_p11 }
  0x47   : > { %p359_p1 = pneg %p358_p0 }
  0x49   : > { %494 = dma.done.wait (%p359_p1), %s253_s30, 32  }
  0x4a   : > { %496 = vsyncadd (%p359_p1), %s253_s30, 4294967264  ;;  %s20_s16 = sadd.s32 1, %s519_s16   ;;  %s691_s12 = smov %s503_s13 }
  0x4b   : > { %p17_p2 = scmp.ge.s32.totalorder %s20_s16, 4   ;;  %s692_s13 = smov %s507_s14 }
  0x4c   : > { %s693_s14 = smov %s599_s25  ;;  %s694_s0 = smov %s515_s15 }
  0x4d   : > { %s695_s15 = smov %s697_s19  ;;  %19 = sbr.rel (!%p17_p2) target bundleno = 6 (0x6), region = 80 }
  0x52   :  { %258 = vsyncpa [#allocation4], 1 }
  0x53   :  { %260 = vsyncpa [#allocation4 + $0x1], 1 }
  0x54   :  { %261 = vsyncpa [#allocation5], 1 }
  0x55   :  { %263 = vsyncpa [#allocation5 + $0x1], 1 }

</bundles_post_ra>
